<compile_context>
chip_gen: v7x
topology: tpu7x:2x2x1
jax: 0.10.0
libtpu: 0.0.40
codegen_flags: <defaults>
</compile_context>

<pallas_src>
import jax
import jax.numpy as jnp
from jax.experimental import pallas as pl
from jax.experimental.pallas import tpu as pltpu


def _mha_map_kernel(q_ref, k_ref, wqh_ref, bqh_ref, wkh_ref, bkh_ref,
                    o_ref, m_ref, l_ref):
    """One grid step = (batch b, pass p, hw-tile t, head h).

    pass 0: accumulate online-softmax stats (row max m, row sum l) over every
            head-aligned column tile of this batch element.
    pass 1: recompute the tile's logits and store exp(logits - m) / l.
    """
    p = pl.program_id(1)
    t = pl.program_id(2)
    h = pl.program_id(3)

    # Reset the per-batch softmax statistics at the first column step.
    @pl.when((p == 0) & (t == 0) & (h == 0))
    def _():
        m_ref[...] = jnp.full_like(m_ref, -jnp.inf)
        l_ref[...] = jnp.zeros_like(l_ref)

    q = q_ref[0]            # [Q, Dq]   bf16
    k = k_ref[0]            # [Dq, T]   bf16  (channels-major, lane-dense on HW)
    wq_h = wqh_ref[0]       # [Dq, c]   bf16  (pre-scaled by normalize_fact)
    wk_h = wkh_ref[0]       # [c, Dq]   bf16

    # Per-head projections: bf16 MXU matmuls, f32 accumulation, f32 bias adds.
    q_h = jnp.dot(q, wq_h, preferred_element_type=jnp.float32) + bqh_ref[0]  # [Q, c]
    k_h = jnp.dot(wk_h, k, preferred_element_type=jnp.float32) + bkh_ref[0]  # [c, T]

    # Head-aligned logits tile (this column tile lives entirely inside head h),
    # written directly in the lane-dense [Q, T] output layout.
    logits = jnp.dot(q_h.astype(jnp.bfloat16), k_h.astype(jnp.bfloat16),
                     preferred_element_type=jnp.float32)                     # [Q, T]

    @pl.when(p == 0)
    def _():
        m_old = m_ref[...]
        m_new = jnp.maximum(m_old, jnp.max(logits, axis=-1, keepdims=True))
        l_ref[...] = (l_ref[...] * jnp.exp(m_old - m_new)
                      + jnp.sum(jnp.exp(logits - m_new), axis=-1, keepdims=True))
        m_ref[...] = m_new

    @pl.when(p == 1)
    def _():
        # Exact reciprocal: the vector is only [Q, 1], cost is negligible.
        inv = pl.reciprocal(l_ref[...], approx=False)
        o_ref[0] = (jnp.exp(logits - m_ref[...]) * inv).astype(o_ref.dtype)
        # dropout(p=0.0) is the identity; omitted.


def _pick_col_tile(hw, max_tile=2048):
    """Largest multiple of 128 that divides hw (<= max_tile); else full hw."""
    if hw % 128 != 0:
        return hw
    best = 128
    d = 128
    while d <= min(hw, max_tile):
        if hw % d == 0:
            best = d
        d += 128
    return best


def _tile_bytes(rows, cols, itemsize):
    r = -(-rows // 8) * 8
    c = -(-cols // 128) * 128
    return r * c * itemsize


def mh_attention_map(q, k, wq, bq, wk, bk, *, num_heads, hidden_dim,
                     col_tile=None):
    """q: [B, Q, Dq]; k: [B, Dq, H, W] (NCHW). Returns [B, Q, N, H, W] float32."""
    B, Qn, Dq = q.shape
    _, Dk, H, W = k.shape
    assert Dk == Dq
    assert hidden_dim % num_heads == 0
    HW = H * W
    head_dim = hidden_dim // num_heads
    normalize_fact = float(hidden_dim / num_heads) ** (-0.5)

    T = _pick_col_tile(HW) if col_tile is None else col_tile
    assert HW % T == 0 and (T % 128 == 0 or T == HW), (HW, T)
    tiles_per_head = HW // T

    # ---- layout plumbing (all free reshapes / tiny weight transposes) -------
    k_cm = k.reshape(B, Dq, HW).astype(jnp.bfloat16)                # [B, Dq, HW]
    q_b = q.astype(jnp.bfloat16)                                    # [B, Q, Dq]
    # Per-head weight/bias blocks, selected by BlockSpec index_map in the kernel.
    wq_heads = ((wq.T * normalize_fact)
                .reshape(Dq, num_heads, head_dim)
                .transpose(1, 0, 2).astype(jnp.bfloat16))           # [N, Dq, c]
    bq_heads = (bq * normalize_fact).reshape(num_heads, 1, head_dim).astype(jnp.float32)
    wk_heads = wk.reshape(num_heads, head_dim, Dq).astype(jnp.bfloat16)   # [N, c, Dq]
    bk_heads = bk.reshape(num_heads, head_dim, 1).astype(jnp.float32)

    # ---- VMEM budget (double-buffered per-step blocks + scratch + headroom) -
    est = 2 * (_tile_bytes(Qn, Dq, 2)            # q block (bf16)
               + _tile_bytes(Dq, T, 2)           # k tile (bf16)
               + _tile_bytes(Qn, T, 4)           # out tile (f32)
               + _tile_bytes(Dq, head_dim, 2)    # wq head
               + _tile_bytes(1, head_dim, 4)     # bq head
               + _tile_bytes(head_dim, Dq, 2)    # wk head
               + _tile_bytes(head_dim, 1, 4))    # bk head
    est += 2 * _tile_bytes(Qn, 1, 4)             # m, l scratch
    vmem_limit = int(min(max(32 << 20, 2 * est + (4 << 20)), 64 << 20))

    out = pl.pallas_call(
        _mha_map_kernel,
        out_shape=jax.ShapeDtypeStruct((B, Qn, num_heads * HW), jnp.float32),
        grid_spec=pltpu.PrefetchScalarGridSpec(
            num_scalar_prefetch=0,
            # (batch, pass, hw_tile, head): head innermost so the k hw-tile's
            # block index is constant across the head loop (no re-fetch).
            grid=(B, 2, tiles_per_head, num_heads),
            in_specs=[
                pl.BlockSpec((1, Qn, Dq), lambda b, p, t, h: (b, 0, 0)),
                pl.BlockSpec((1, Dq, T), lambda b, p, t, h: (b, 0, t)),
                pl.BlockSpec((1, Dq, head_dim), lambda b, p, t, h: (h, 0, 0)),
                pl.BlockSpec((1, 1, head_dim), lambda b, p, t, h: (h, 0, 0)),
                pl.BlockSpec((1, head_dim, Dq), lambda b, p, t, h: (h, 0, 0)),
                pl.BlockSpec((1, head_dim, 1), lambda b, p, t, h: (h, 0, 0)),
            ],
            # Pass 0 parks the output on block 0 (never written there, never
            # flushed with garbage since the index only changes after pass 1's
            # first step rewrites it); pass 1 visits each column block once.
            out_specs=pl.BlockSpec(
                (1, Qn, T),
                lambda b, p, t, h: (b, 0, (h * tiles_per_head + t) * p)),
            scratch_shapes=[
                pltpu.VMEM((Qn, 1), jnp.float32),   # running row max m
                pltpu.VMEM((Qn, 1), jnp.float32),   # running row sum l
            ],
        ),
        compiler_params=pltpu.CompilerParams(
            dimension_semantics=("parallel", "arbitrary", "arbitrary", "arbitrary"),
            vmem_limit_bytes=vmem_limit,
        ),
    )(q_b, k_cm, wq_heads, bq_heads, wk_heads, bk_heads)

    return out.reshape(B, Qn, num_heads, H, W)


def _xavier_uniform(key, out_dim, in_dim):
    limit = (6.0 / (in_dim + out_dim)) ** 0.5
    return jax.random.uniform(key, (out_dim, in_dim), jnp.float32, -limit, limit)


def _reference(q, k, wq, bq, wk, bk, *, num_heads, hidden_dim):
    B, Qn, Dq = q.shape
    _, _, H, W = k.shape
    c = hidden_dim // num_heads
    norm = float(hidden_dim / num_heads) ** (-0.5)
    q_lin = q @ wq.T + bq                                     # [B, Q, hidden]
    k_lin = jnp.einsum('oc,bchw->bohw', wk, k) + bk[None, :, None, None]
    qh = q_lin.reshape(B, Qn, num_heads, c)
    kh = k_lin.reshape(B, num_heads, c, H, W)
    weights = jnp.einsum('bqnc,bnchw->bqnhw', qh * norm, kh)
    flat = weights.reshape(B, Qn, -1)
    flat = jax.nn.softmax(flat, axis=-1)
    return flat.reshape(weights.shape)


if __name__ == "__main__":
    B, Qn = 2, 8
    query_dim, hidden_dim, num_heads = 32, 32, 8
    H = W = 16

    key = jax.random.PRNGKey(0)
    kq, kk, kwq, kwk = jax.random.split(key, 4)

    q = jax.random.normal(kq, (B, Qn, query_dim), jnp.float32)
    k = jax.random.normal(kk, (B, query_dim, H, W), jnp.float32)

    # Deterministic parameter init matching the module's __init__:
    # xavier_uniform weights, zero biases.
    wq = _xavier_uniform(kwq, hidden_dim, query_dim)
    wk = _xavier_uniform(kwk, hidden_dim, query_dim)
    bq = jnp.zeros((hidden_dim,), jnp.float32)
    bk = jnp.zeros((hidden_dim,), jnp.float32)

    # col_tile=128 (< HW=256) so the online-softmax column tiling is exercised.
    out = mh_attention_map(q, k, wq, bq, wk, bk,
                           num_heads=num_heads, hidden_dim=hidden_dim,
                           col_tile=128)
    out = jax.block_until_ready(out)

    ref = _reference(q, k, wq, bq, wk, bk,
                     num_heads=num_heads, hidden_dim=hidden_dim)
    assert out.shape == (B, Qn, num_heads, H, W)
    # Tolerance relaxed vs the pure-f32 reference because matmuls run in bf16
    # (bias adds, softmax and normalization are f32).
    assert jnp.allclose(out, ref, atol=2e-3, rtol=5e-2)

    print("KERNEL_OK")
</pallas_src>

<mosaic_0001>
module attributes {stable_mosaic.version = 11 : i64} {
  func.func @_mha_map_kernel(%arg0: i32, %arg1: i32, %arg2: i32, %arg3: i32, %arg4: memref<1x8x32xbf16, #tpu.memory_space<vmem>>, %arg5: memref<1x32x128xbf16, #tpu.memory_space<vmem>>, %arg6: memref<1x32x4xbf16, #tpu.memory_space<vmem>>, %arg7: memref<1x1x4xf32, #tpu.memory_space<vmem>>, %arg8: memref<1x4x32xbf16, #tpu.memory_space<vmem>>, %arg9: memref<1x4x1xf32, #tpu.memory_space<vmem>>, %arg10: memref<1x8x128xf32, #tpu.memory_space<vmem>>, %arg11: memref<8x1xf32, #tpu.memory_space<vmem>>, %arg12: memref<8x1xf32, #tpu.memory_space<vmem>>) attributes {dimension_semantics = [#tpu.dimension_semantics<parallel>, #tpu.dimension_semantics<arbitrary>, #tpu.dimension_semantics<arbitrary>, #tpu.dimension_semantics<arbitrary>], iteration_bounds = array<i64: 2, 2, 2, 8>, scalar_prefetch = 0 : i64, scratch_operands = 2 : i64, tpu.core_type = #tpu.core_type<tc>, window_params = [{transform_indices = @transform_0, window_bounds = array<i64: 1, 8, 32>}, {transform_indices = @transform_1, window_bounds = array<i64: 1, 32, 128>}, {transform_indices = @transform_2, window_bounds = array<i64: 1, 32, 4>}, {transform_indices = @transform_3, window_bounds = array<i64: 1, 1, 4>}, {transform_indices = @transform_4, window_bounds = array<i64: 1, 4, 32>}, {transform_indices = @transform_5, window_bounds = array<i64: 1, 4, 1>}, {transform_indices = @transform_6, window_bounds = array<i64: 1, 8, 128>}]} {
    %c0_i32 = arith.constant 0 : i32
    %0 = arith.cmpi eq, %arg1, %c0_i32 : i32
    %c0_i32_0 = arith.constant 0 : i32
    %1 = arith.cmpi eq, %arg2, %c0_i32_0 : i32
    %2 = arith.andi %0, %1 : i1
    %c0_i32_1 = arith.constant 0 : i32
    %3 = arith.cmpi eq, %arg3, %c0_i32_1 : i32
    %4 = arith.andi %2, %3 : i1
    %5 = arith.extui %4 : i1 to i32
    %c0_i32_2 = arith.constant 0 : i32
    %6 = arith.cmpi ne, %5, %c0_i32_2 : i32
    scf.if %6 {
      %cst_25 = arith.constant 0xFF800000 : f32
      %34 = vector.broadcast %cst_25 : f32 to vector<8x1xf32>
      %c0_26 = arith.constant 0 : index
      %c0_27 = arith.constant 0 : index
      %35 = vector.load %arg11[%c0_26, %c0_27] : memref<8x1xf32, #tpu.memory_space<vmem>>, vector<8x1xf32>
      tpu.vector_store %arg11[%c0_26, %c0_27], %34 {strides = array<i32>} : memref<8x1xf32, #tpu.memory_space<vmem>>, vector<8x1xf32>,
      %cst_28 = arith.constant 0.000000e+00 : f32
      %36 = vector.broadcast %cst_28 : f32 to vector<8x1xf32>
      %c0_29 = arith.constant 0 : index
      %c0_30 = arith.constant 0 : index
      %37 = vector.load %arg12[%c0_29, %c0_30] : memref<8x1xf32, #tpu.memory_space<vmem>>, vector<8x1xf32>
      tpu.vector_store %arg12[%c0_29, %c0_30], %36 {strides = array<i32>} : memref<8x1xf32, #tpu.memory_space<vmem>>, vector<8x1xf32>,
    } else {
    }
    %c0 = arith.constant 0 : index
    %c0_3 = arith.constant 0 : index
    %c0_4 = arith.constant 0 : index
    %7 = vector.load %arg4[%c0, %c0_3, %c0_4] : memref<1x8x32xbf16, #tpu.memory_space<vmem>>, vector<1x8x32xbf16>
    %8 = vector.shape_cast %7 : vector<1x8x32xbf16> to vector<8x32xbf16>
    %c0_5 = arith.constant 0 : index
    %c0_6 = arith.constant 0 : index
    %c0_7 = arith.constant 0 : index
    %9 = vector.load %arg5[%c0_5, %c0_6, %c0_7] : memref<1x32x128xbf16, #tpu.memory_space<vmem>>, vector<1x32x128xbf16>
    %10 = vector.shape_cast %9 : vector<1x32x128xbf16> to vector<32x128xbf16>
    %c0_8 = arith.constant 0 : index
    %c0_9 = arith.constant 0 : index
    %c0_10 = arith.constant 0 : index
    %11 = vector.load %arg6[%c0_8, %c0_9, %c0_10] : memref<1x32x4xbf16, #tpu.memory_space<vmem>>, vector<1x32x4xbf16>
    %12 = vector.shape_cast %11 : vector<1x32x4xbf16> to vector<32x4xbf16>
    %c0_11 = arith.constant 0 : index
    %c0_12 = arith.constant 0 : index
    %c0_13 = arith.constant 0 : index
    %13 = vector.load %arg8[%c0_11, %c0_12, %c0_13] : memref<1x4x32xbf16, #tpu.memory_space<vmem>>, vector<1x4x32xbf16>
    %14 = vector.shape_cast %13 : vector<1x4x32xbf16> to vector<4x32xbf16>
    %cst = arith.constant dense<0.000000e+00> : vector<8x4xf32>
    %15 = tpu.matmul %8, %12, %cst {dimension_numbers = #tpu.dot_dimension_numbers<[1], [0], [0], [1], [0, 0, 1, 1], [], []>} : vector<8x32xbf16>, vector<32x4xbf16>, vector<8x4xf32> -> vector<8x4xf32>
    %c0_14 = arith.constant 0 : index
    %c0_15 = arith.constant 0 : index
    %c0_16 = arith.constant 0 : index
    %16 = vector.load %arg7[%c0_14, %c0_15, %c0_16] : memref<1x1x4xf32, #tpu.memory_space<vmem>>, vector<1x1x4xf32>
    %17 = vector.shape_cast %16 : vector<1x1x4xf32> to vector<1x4xf32>
    %18 = vector.broadcast %17 : vector<1x4xf32> to vector<8x4xf32>
    %19 = arith.addf %15, %18 : vector<8x4xf32>
    %cst_17 = arith.constant dense<0.000000e+00> : vector<4x128xf32>
    %20 = tpu.matmul %14, %10, %cst_17 {dimension_numbers = #tpu.dot_dimension_numbers<[1], [0], [0], [1], [0, 0, 1, 1], [], []>} : vector<4x32xbf16>, vector<32x128xbf16>, vector<4x128xf32> -> vector<4x128xf32>
    %c0_18 = arith.constant 0 : index
    %c0_19 = arith.constant 0 : index
    %c0_20 = arith.constant 0 : index
    %21 = vector.load %arg9[%c0_18, %c0_19, %c0_20] : memref<1x4x1xf32, #tpu.memory_space<vmem>>, vector<1x4x1xf32>
    %22 = vector.shape_cast %21 : vector<1x4x1xf32> to vector<4x1xf32>
    %23 = vector.broadcast %22 : vector<4x1xf32> to vector<4x128xf32>
    %24 = arith.addf %20, %23 : vector<4x128xf32>
    %25 = arith.truncf %19 : vector<8x4xf32> to vector<8x4xbf16>
    %26 = arith.truncf %24 : vector<4x128xf32> to vector<4x128xbf16>
    %cst_21 = arith.constant dense<0.000000e+00> : vector<8x128xf32>
    %27 = tpu.matmul %25, %26, %cst_21 {dimension_numbers = #tpu.dot_dimension_numbers<[1], [0], [0], [1], [0, 0, 1, 1], [], []>} : vector<8x4xbf16>, vector<4x128xbf16>, vector<8x128xf32> -> vector<8x128xf32>
    %c0_i32_22 = arith.constant 0 : i32
    %28 = arith.cmpi eq, %arg1, %c0_i32_22 : i32
    %29 = arith.extui %28 : i1 to i32
    %c0_i32_23 = arith.constant 0 : i32
    %30 = arith.cmpi ne, %29, %c0_i32_23 : i32
    scf.if %30 {
      %c0_25 = arith.constant 0 : index
      %c0_26 = arith.constant 0 : index
      %34 = vector.load %arg11[%c0_25, %c0_26] : memref<8x1xf32, #tpu.memory_space<vmem>>, vector<8x1xf32>
      %cst_27 = arith.constant dense<0xFF800000> : vector<8xf32>
      %35 = vector.multi_reduction <maximumf>, %27, %cst_27 [1] : vector<8x128xf32> to vector<8xf32>
      %36 = vector.shape_cast %35 : vector<8xf32> to vector<8x1xf32>
      %37 = arith.maximumf %34, %36 : vector<8x1xf32>
      %c0_28 = arith.constant 0 : index
      %c0_29 = arith.constant 0 : index
      %38 = vector.load %arg12[%c0_28, %c0_29] : memref<8x1xf32, #tpu.memory_space<vmem>>, vector<8x1xf32>
      %39 = arith.subf %34, %37 : vector<8x1xf32>
      %40 = math.exp %39 : vector<8x1xf32>
      %41 = arith.mulf %38, %40 : vector<8x1xf32>
      %42 = vector.broadcast %37 : vector<8x1xf32> to vector<8x128xf32>
      %43 = arith.subf %27, %42 : vector<8x128xf32>
      %44 = math.exp %43 : vector<8x128xf32>
      %cst_30 = arith.constant dense<0.000000e+00> : vector<8xf32>
      %45 = vector.multi_reduction <add>, %44, %cst_30 [1] : vector<8x128xf32> to vector<8xf32>
      %46 = vector.shape_cast %45 : vector<8xf32> to vector<8x1xf32>
      %47 = arith.addf %41, %46 : vector<8x1xf32>
      %c0_31 = arith.constant 0 : index
      %c0_32 = arith.constant 0 : index
      %48 = vector.load %arg12[%c0_31, %c0_32] : memref<8x1xf32, #tpu.memory_space<vmem>>, vector<8x1xf32>
      tpu.vector_store %arg12[%c0_31, %c0_32], %47 {strides = array<i32>} : memref<8x1xf32, #tpu.memory_space<vmem>>, vector<8x1xf32>,
      %c0_33 = arith.constant 0 : index
      %c0_34 = arith.constant 0 : index
      %49 = vector.load %arg11[%c0_33, %c0_34] : memref<8x1xf32, #tpu.memory_space<vmem>>, vector<8x1xf32>
      tpu.vector_store %arg11[%c0_33, %c0_34], %37 {strides = array<i32>} : memref<8x1xf32, #tpu.memory_space<vmem>>, vector<8x1xf32>,
    } else {
    }
    %c1_i32 = arith.constant 1 : i32
    %31 = arith.cmpi eq, %arg1, %c1_i32 : i32
    %32 = arith.extui %31 : i1 to i32
    %c0_i32_24 = arith.constant 0 : i32
    %33 = arith.cmpi ne, %32, %c0_i32_24 : i32
    scf.if %33 {
      %c0_25 = arith.constant 0 : index
      %c0_26 = arith.constant 0 : index
      %34 = vector.load %arg12[%c0_25, %c0_26] : memref<8x1xf32, #tpu.memory_space<vmem>>, vector<8x1xf32>
      %35 = tpu.reciprocal %34 : vector<8x1xf32> -> vector<8x1xf32>
      %c0_27 = arith.constant 0 : index
      %c0_28 = arith.constant 0 : index
      %36 = vector.load %arg11[%c0_27, %c0_28] : memref<8x1xf32, #tpu.memory_space<vmem>>, vector<8x1xf32>
      %37 = vector.broadcast %36 : vector<8x1xf32> to vector<8x128xf32>
      %38 = arith.subf %27, %37 : vector<8x128xf32>
      %39 = math.exp %38 : vector<8x128xf32>
      %40 = vector.broadcast %35 : vector<8x1xf32> to vector<8x128xf32>
      %41 = arith.mulf %39, %40 : vector<8x128xf32>
      %c0_29 = arith.constant 0 : index
      %c0_30 = arith.constant 0 : index
      %c0_31 = arith.constant 0 : index
      %42 = vector.load %arg10[%c0_29, %c0_30, %c0_31] : memref<1x8x128xf32, #tpu.memory_space<vmem>>, vector<1x8x128xf32>
      %43 = vector.shape_cast %42 : vector<1x8x128xf32> to vector<8x128xf32>
      %44 = vector.shape_cast %41 : vector<8x128xf32> to vector<1x8x128xf32>
      tpu.vector_store %arg10[%c0_29, %c0_30, %c0_31], %44 {strides = array<i32>} : memref<1x8x128xf32, #tpu.memory_space<vmem>>, vector<1x8x128xf32>,
    } else {
    }
    return
  }
  func.func @transform_0(%arg0: i32, %arg1: i32, %arg2: i32, %arg3: i32) -> (i32, i32, i32) {
    %c0_i32 = arith.constant 0 : i32
    %c0_i32_0 = arith.constant 0 : i32
    %c0_i32_1 = arith.constant 0 : i32
    return %arg0, %c0_i32, %c0_i32_0 : i32, i32, i32
  }
  func.func @transform_1(%arg0: i32, %arg1: i32, %arg2: i32, %arg3: i32) -> (i32, i32, i32) {
    %c0_i32 = arith.constant 0 : i32
    %c0_i32_0 = arith.constant 0 : i32
    return %arg0, %c0_i32, %arg2 : i32, i32, i32
  }
  func.func @transform_2(%arg0: i32, %arg1: i32, %arg2: i32, %arg3: i32) -> (i32, i32, i32) {
    %c0_i32 = arith.constant 0 : i32
    %c0_i32_0 = arith.constant 0 : i32
    %c0_i32_1 = arith.constant 0 : i32
    return %arg3, %c0_i32, %c0_i32_0 : i32, i32, i32
  }
  func.func @transform_3(%arg0: i32, %arg1: i32, %arg2: i32, %arg3: i32) -> (i32, i32, i32) {
    %c0_i32 = arith.constant 0 : i32
    %c0_i32_0 = arith.constant 0 : i32
    %c0_i32_1 = arith.constant 0 : i32
    return %arg3, %c0_i32, %c0_i32_0 : i32, i32, i32
  }
  func.func @transform_4(%arg0: i32, %arg1: i32, %arg2: i32, %arg3: i32) -> (i32, i32, i32) {
    %c0_i32 = arith.constant 0 : i32
    %c0_i32_0 = arith.constant 0 : i32
    %c0_i32_1 = arith.constant 0 : i32
    return %arg3, %c0_i32, %c0_i32_0 : i32, i32, i32
  }
  func.func @transform_5(%arg0: i32, %arg1: i32, %arg2: i32, %arg3: i32) -> (i32, i32, i32) {
    %c0_i32 = arith.constant 0 : i32
    %c0_i32_0 = arith.constant 0 : i32
    %c0_i32_1 = arith.constant 0 : i32
    return %arg3, %c0_i32, %c0_i32_0 : i32, i32, i32
  }
  func.func @transform_6(%arg0: i32, %arg1: i32, %arg2: i32, %arg3: i32) -> (i32, i32, i32) {
    %c2_i32 = arith.constant 2 : i32
    %0 = arith.muli %arg3, %c2_i32 : i32
    %1 = arith.addi %0, %arg2 : i32
    %2 = arith.muli %1, %arg1 : i32
    %c0_i32 = arith.constant 0 : i32
    %c0_i32_0 = arith.constant 0 : i32
    return %arg0, %c0_i32, %2 : i32, i32, i32
  }
}

</mosaic_0001>

<bundles_post_ra>
// kernel: tpu_custom_call.1
= control target key start
LH: loop header
LB: loop body
LE: loop exit
PB: predicated region body
PF: predicated region fallthrough
CT: control target
= control target key end

     0   :  { %s1510_s0 = inlined_call_operand.vmem [shape: bf16[2,8,32], index: 0, kind: input, shape index: {}]   ;;  %s1511_s1 = inlined_call_operand.vmem [shape: bf16[2,32,256], index: 1, kind: input, shape index: {}]   ;;  %s1512_s2 = inlined_call_operand.vmem [shape: bf16[8,32,4], index: 2, kind: input, shape index: {}]   ;;  %s1513_s3 = inlined_call_operand.vmem [shape: f32[8,1,4], index: 3, kind: input, shape index: {}]   ;;  %s1514_s4 = inlined_call_operand.vmem [shape: bf16[8,4,32], index: 4, kind: input, shape index: {}]   ;;  %s1515_s5 = inlined_call_operand.vmem [shape: f32[8,4,1], index: 5, kind: input, shape index: {}]   ;;  %s1516_s6 = inlined_call_operand.hbm [shape: f32[2,8,2048], index: 6, kind: output, shape index: {}]  }
   0x1   :  { %1531 = sst [smem:[#allocation22_spill]] %s1511_s1 }
   0x2   :  { %1532 = sst [smem:[#allocation23_spill]] %s1513_s3 }
   0x3   :  { %1533 = sst [smem:[#allocation24_spill]] %s1514_s4 }
   0x4   :  { %1534 = sst [smem:[#allocation25_spill]] %s1515_s5 }
   0x5   :  { %1535 = sst [smem:[#allocation26_spill]] %s1516_s6 }
   0x6   :  { %11 = vsyncpa [#allocation6], 0 }
   0x7   :  { %13 = vsyncpa [#allocation6 + $0x1], 0  ;;  %s1234_s21 = smov 0   ;;  %s1236_s22 = smov 0  }
   0x8   :  { %s1238_s23 = smov 0   ;;  %s1240_s24 = smov 0  }
   0x9   :  { %s1242_s25 = smov 0   ;;  %s1244_s26 = smov 0  }
   0xa   :  { %s1246_s27 = smov 0   ;;  %s1248_s28 = smov 0  }
   0xb   :  { %s1250_s29 = smov 0   ;;  %s1252_s30 = smov 0  }
   0xc   :  { %s1254_s7 = smov 0   ;;  %s1256_s8 = smov 0  }
   0xd   :  { %s1258_s9 = smov 0   ;;  %s1260_s10 = smov 0  }
   0xe LB: > { %1536 = sst [smem:[#allocation8_spill]] %s1137_s21  ;;  %s842_s11 = sadd.s32 4294967295, %s1189_s10   ;;  %s1189_s10 = sphi %s1260_s10, %s19_s10   ;;  %s1185_s9 = sphi %s1258_s9, %s1581_s9   ;;  %s1181_s8 = sphi %s1256_s8, %s1580_s8   ;;  %s1177_s7 = sphi %s1254_s7, %s1579_s7   ;;  %s1173_s30 = sphi %s1252_s30, %s1572_s30   ;;  %s1169_s29 = sphi %s1250_s29, %s1571_s29   ;;  %s1165_s28 = sphi %s1248_s28, %s1570_s28   ;;  %s1161_s27 = sphi %s1246_s27, %s1569_s27   ;;  %s1157_s26 = sphi %s1244_s26, %s1568_s26   ;;  %s1153_s25 = sphi %s1242_s25, %s1567_s25   ;;  %s1149_s24 = sphi %s1240_s24, %s1566_s24   ;;  %s1145_s23 = sphi %s1238_s23, %s1565_s23   ;;  %s1141_s22 = sphi %s1236_s22, %s1578_s22   ;;  %s1137_s21 = sphi %s1234_s21, %s1577_s21  }
   0xf   : > { %1537 = sst [smem:[#allocation9_spill]] %s1145_s23  ;;  %s34_s13 = sadd.s32 1, %s1173_s30 }
  0x10   : > { %1538 = sst [smem:[#allocation10_spill]] %s1153_s25  ;;  %p35_p0 = scmp.ge.s32.totalorder %s34_s13, 8 }
  0x11   : > { %1539 = sst [smem:[#allocation11_spill]] %s1173_s30  ;;  %s37_s14 = sadd.s32 1, %s1177_s7 }
  0x12   : > { %1540 = sst [smem:[#allocation12_spill]] %s1177_s7  ;;  %s41_s15 = sadd.s32 1, %s1181_s8 }
  0x13   : > { %1541 = sst [smem:[#allocation13_spill]] %s1181_s8  ;;  %s45_s16 = sadd.s32 1, %s1185_s9 }
  0x14   : > { %1542 = sst [smem:[#allocation14_spill]] %s1185_s9  ;;  %s1583_s13 = smov (%p35_p0, %s34_s13), 0 }
  0x15   : > { %1543 = sst [smem:[#allocation15_spill]] %s1583_s13  ;;  %s1585_s14 = smov (!%p35_p0, %s37_s14), %s1177_s7 }
  0x16   : > { %p87_p1 = scmp.ne.s32.totalorder %s1153_s25, %s1149_s24  ;;  %p88_p2 = scmp.eq.s32.totalorder %s1189_s10, 0 }
  0x17   : > { %p39_p3 = scmp.ge.s32.totalorder %s1585_s14, 2  ;;  %s844_s17 = sshll.u32 %s1173_s30, 1 }
  0x18   : > { %p1317_p4 = por %p88_p2, %p87_p1  ;;  %s208_s19 = sadd.s32 %s1177_s7, %s844_s17 }
  0x19   : > { %s1587_s14 = smov (%p39_p3, %s1585_s14), 0  ;;  %s1589_s15 = smov (!%p39_p3, %s41_s15), %s1181_s8 }
  0x1a   : > { %1545 = sst [smem:[#allocation16_spill]] %s1587_s14  ;;  %s76_s20 = ssub.s32 %s1177_s7, %s1587_s14 }
  0x1b   : > { %s80_s12 = sadd.s32 1, %s1153_s25  ;;  %p43_p5 = scmp.ge.s32.totalorder %s1589_s15, 2 }
  0x1c   : > { %s845_s6 = sshll.u32 %s1583_s13, 1  ;;  %s209_s30 = smul.u32 %s1181_s8, %s208_s19 }
  0x1d   : > { %s211_s5 = sadd.s32 %s845_s6, %s1587_s14  ;;  %s1591_s15 = smov (%p43_p5, %s1589_s15), 0 }
  0x1e   : > { %1546 = sst [smem:[#allocation17_spill]] %s1591_s15  ;;  %s1593_s16 = smov (!%p43_p5, %s45_s16), %s1185_s9 }
  0x1f   : > { %s212_s17 = smul.u32 %s211_s5, %s1591_s15  ;;  %p228_p6 = scmp.ne.s32.totalorder %s1145_s23, %s1141_s22 }
  0x20   : > { %p47_p7 = scmp.ge.s32.totalorder %s1593_s16, 2  ;;  %p229_p8 = scmp.eq.s32.totalorder %s842_s11, 63 }
  0x21   : > { %s214_s4 = ssub.s32 %s209_s30, %s212_s17  ;;  %p234_p9 = scmp.ne.s32.totalorder %s1141_s22, %s1137_s21 }
  0x22   : > { %s1595_s16 = smov (%p47_p7, %s1593_s16), 0  ;;  %p1341_p10 = por %p229_p8, %p228_p6 }
  0x23   : > { %1547 = sst [smem:[#allocation18_spill]] %s1595_s16  ;;  %s1549_s6 = sadd.s32 4294967294, %s1189_s10  }
  0x24   : > { %p235_p11 = scmp.eq.s32.totalorder %s1549_s6, 63  ;;  %s75_s19 = ssub.s32 %s1185_s9, %s1595_s16 }
  0x25   : > { %s218_s14 = sadd.s32 1, %s1145_s23  ;;  %s77_s13 = sor.u32 %s76_s20, %s75_s19 }
  0x26   : > { %s215_s5 = sor.u32 %s214_s4, %s75_s19  ;;  %p78_p12 = scmp.eq.s32.totalorder %s77_s13, 0 }
  0x27   : > { %p216_p13 = scmp.eq.s32.totalorder %s215_s5, 0  ;;  %p1350_p0 = por %p235_p11, %p234_p9 }
  0x28   : > { %s1355_s30 = scalar_select %p78_p12, %s1153_s25, %s80_s12  }
  0x29   : > { %s1550_s15 = scalar_select %p1350_p0, 1, 0 }
  0x2a   : > { %1552 = sst [smem:[#allocation20_spill]] %s1355_s30  ;;  %p847_p1 = scmp.ge.s32.totalorder %s1189_s10, 64 }
  0x2b   : > { %1551 = sst [smem:[#allocation19_spill]] %s1550_s15 }
  0x2c   : > { %s1358_s11 = scalar_select %p216_p13, %s1145_s23, %s218_s14  }
  0x2d   : > { %251 = sbr.rel (%p847_p1) target bundleno = 64 (0x40), region = 16 }
  0x2e   : > { %1553 = sst [smem:[#allocation21_spill]] %s1358_s11 }
  0x34   : > { %261 = sbr.rel (!%p1317_p4) target bundleno = 64 (0x40), region = 24  ;;  %s263_s4 = sand.u32 (%p1317_p4), 1, %s1153_s25  }
  0x35   : > { %s849_s13 = sshll.u32 (%p1317_p4), %s1185_s9, 3  ;;  %s848_s20 = sshll.u32 (%p1317_p4), %s263_s4, 4 }
  0x36   : > { %s267_s17 = sadd.s32 (%p1317_p4), %s1177_s7, %s849_s13  ;;  %s1554_s1 = sld [smem:[#allocation22_spill]] (%p1317_p4) }
  0x37   : > { %s850_s6 = sshll.u32 (%p1317_p4), %s267_s17, 2  ;;  %s265_s14 = scalar_lea.vmem (%p1317_p4), [#allocation4], %s848_s20 }
  0x3c   : > { %s269_s12 = scalar_lea.vmem %s1554_s1, %s850_s6 }
  0x3d   : > { %v285_v0 = vld [vmem:[%s269_s12] sm:$0xf]  ;;  %v287_v1 = vld [vmem:[%s269_s12 + $0x8] sm:$0xf]  ;;  %v289_v2 = vld [vmem:[%s269_s12 + $0x10] sm:$0xf] }
  0x3e   : > { %286 = vst [vmem:[%s265_s14] sm:$0xf] %v285_v0  ;;  %288 = vst [vmem:[%s265_s14 + $0x4] sm:$0xf] %v287_v1  ;;  %v291_v3 = vld [vmem:[%s269_s12 + $0x18] sm:$0xf] }
  0x3f   : > { %290 = vst [vmem:[%s265_s14 + $0x8] sm:$0xf] %v289_v2  ;;  %292 = vst [vmem:[%s265_s14 + $0xc] sm:$0xf] %v291_v3 }
  0x40 PF: > { %p851_p2 = scmp.ge.s32.totalorder %s1189_s10, 1  ;;  %p350_p3 = scmp.lt.s32.totalorder %s1189_s10, 65 }
  0x42   : > { %p351_p4 = pnand %p851_p2, %p350_p3 }
  0x43   : > { %s357_s18 = sand.u32 (!%p351_p4), 1, %s1149_s24   ;;  %s1522_s4 = sand.u32 (!%p351_p4), 1, %s1141_s22  }
  0x44   : > { %354 = sbr.rel (%p351_p4) target bundleno = 1143 (0x477), region = 81  ;;  %s1373_s13 = sshll.u32 (!%p351_p4), %s357_s18, 4 }
  0x45   : > { %s1377_s20 = sshll.u32 (!%p351_p4), %s1522_s4, 3  ;;  %p406_p5 = scmp.lt.s32.totalorder (!%p351_p4), %s1169_s29, 1 }
  0x46   : > { %p410_p6 = scmp.lt.s32.totalorder (!%p351_p4), %s1157_s26, 7  ;;  %p430_p7 = scmp.eq.s32.totalorder (!%p351_p4), %s1165_s28, 0 }
  0x47   : > { %p431_p8 = scmp.eq.s32.totalorder (!%p351_p4), %s1161_s27, 0  ;;  %s1555_s8 = sld [smem:[#allocation23_spill]] (!%p351_p4) }
  0x48   : > { %p434_p12 = scmp.eq.s32.totalorder (!%p351_p4), %s1157_s26, 0  ;;  %s359_s4 = scalar_lea.vmem (!%p351_p4), [#allocation4], %s1373_s13 }
  0x49   : > { %p432_p9 = pnand (!%p351_p4), %p431_p8, %p430_p7 }
  0x4b   : > { %s407_s17 = scalar_select %p406_p5, %s1169_s29, 1 }
  0x4c   : > { %s1385_s6 = scalar_select %p410_p6, %s1157_s26, 7 }
  0x4d   : > { %s854_s24 = sshll.u32 %s407_s17, 2  ;;  %s1556_s17 = sld [smem:[#allocation24_spill]] }
  0x4e   : > { %s1390_s12 = scalar_lea.vmem %s1510_s0, %s854_s24  ;;  %s875_s14 = sshll.u32 %s1385_s6, 4 }
  0x4f   : > { %s414_s1 = scalar_lea.vmem %s1512_s2, %s875_s14  ;;  %s417_s7 = scalar_lea.vmem %s1555_s8, %s1385_s6 }
  0x50   : > { %s857_s30 = sshll.u32 %s1385_s6, 1  ;;  %s858_s25 = sshll.u32 %s1385_s6, 2 }
  0x51   : > { %s1557_s24 = sld [smem:[#allocation25_spill]]  ;;  %p433_p11 = pneg %p432_p9 }
  0x52   : > { %s405_s14 = scalar_lea.vmem [#allocation5], %s1377_s20 }
  0x53   : > { %s1405_s15 = scalar_lea.vmem %s1556_s17, %s857_s30  ;;  %p435_p13 = pnand %p434_p12, %p433_p11 }
  0x54   : > { %vm439_vm0 = vcmask (!%p435_p13), 7168   ;;  %v1191_v4 = vmov (!%p435_p13), -inf   ;;  %v1192_v5 = vmov (!%p435_p13), 0.0  }
  0x55   : > { %438 = sbr.rel (%p435_p13) target bundleno = 92 (0x5c), region = 89  ;;  %440 = vst.msk [vmem:[#allocation2] sm:$0xff] (!%p435_p13), %vm439_vm0, %v1191_v4  ;;  %441 = vst.msk [vmem:[#allocation3] sm:$0xff] (!%p435_p13), %vm439_vm0, %v1192_v5 }
  0x57   : > { %s425_s5 = scalar_lea.vmem %s1557_s24, %s858_s25 }
  0x5c PF: > { %v1033_v6 = vld [vmem:[%s359_s4] sm:$0xff]   ;;  %v1193_v7 = vmov 0.0   ;;  %v1034_v8 = vld [vmem:[%s359_s4 + $0x8] sm:$0xff]   ;;  %vm1194_vm1 = vmmov 0   ;;  %v1195_v12 = vmov 0   ;;  %vm471_vm2 = vcmask 261120  }
  0x5d   : > { %892 = vmatprep.subr.bf16.mxu1 %v1193_v7  ;;  %884 = vmatprep.subr.bf16.mxu0 %v1193_v7  ;;  %v1035_v9 = vld [vmem:[%s414_s1] sm:$0xff]   ;;  %v1036_v10 = vld [vmem:[%s414_s1 + $0x8] sm:$0xff]   ;;  %vm582_vm3 = vcmask 1041408   ;;  %vm578_vm4 = vcmask 31744   ;;  %p867_p1 = scmp.ne.s32.totalorder %s1165_s28, 0 }
  0x5e   : > { %893 = vmatpush3.bf16.msra.mxu1 %v1033_v6  ;;  %896 = vmatprep.mubr.msk.bf16.mxu1 %vm1194_vm1, %v1193_v7  ;;  %v515_v11 = vld [vmem:[%s425_s5] sm:$0xf]  ;;  %v1196_v34 = vmov (!%p867_p1), 0   ;;  %vm649_vm5 = vcmask (!%p867_p1), 7168   ;;  %v633_v45 = vld [vmem:[#allocation3] sm:$0xff] (!%p867_p1) }
  0x5f   : > { %894 = vmatprep.subr.bf16.mxu1 %v1193_v7  ;;  %888 = vmatprep.mubr.msk.bf16.mxu0 %vm1194_vm1, %v1193_v7  ;;  %v451_v13 = vld [vmem:[%s1405_s15] sm:$0x3] }
  0x60   : > { %885 = vmatpush3.bf16.msra.mxu0 %v1035_v9  ;;  %1032 = vset.pattern.permute.xlu0 %v1195_v12  ;;  %v442_v14 = vld [vmem:[%s1390_s12] sm:$0xf] }
  0x61   : > { %886 = vmatprep.subr.bf16.mxu0 %v1193_v7  ;;  %518 = vperm.xlu0 %1032, %v515_v11   ;;  %v859_v17 = vld [vmem:[%s417_s7] ss:$0 sm:$0xff] }
  0x62   : > { %895 = vmatpush3.bf16.msra.mxu1 %v1034_v8  ;;  %v629_v35 = vld [vmem:[#allocation2] sm:$0xff] (!%p867_p1) }
  0x64   : > { %887 = vmatpush3.bf16.msra.mxu0 %v1036_v10 }
  0x65   : > { %897 = vmatmul.mubr.msk.bf16.vlgmr.msra.gmra.mrb[0].mxu1 %vm471_vm2, %v451_v13  ;;  %900 = vmatprep.subr.bf16.mxu0 %v1193_v7 }
  0x66   : > { %1037 = vset.pattern.permute.xlu0 (!%p867_p1), %v1196_v34 }
  0x67   : > { %889 = vmatmul.mubr.msk.bf16.vlgmr.msra.gmra.mrb[0].mxu0 %vm471_vm2, %v442_v14 }
  0x68   : > { %902 = vmatprep.mubr.msk.bf16.mxu0 %vm1194_vm1, %v1193_v7 }
  0xe0   : > { %v519_v15 = vpop.permute.xlu0 %518 }
 0x138   : > { %v570_v16 = vpop.f32.mrb[0].mxu1 }
 0x139   : > { %v571_v18 = vadd.f32 %v570_v16, %v519_v15  ;;  %v898_v19 = vpop.f32.mrb[1].mxu1 }
 0x13a   : > { %v573_v20 = vpop.f32.mrb[2].mxu1  ;;  %v509_v21 = vpop.f32.mrb[0].mxu0 }
 0x13b   : > { %v577_v22 = vpack.c.bf16 %v571_v18, %v571_v18  ;;  %v899_v23 = vpop.f32.mrb[3].mxu1  ;;  %v510_v24 = vadd.f32 %v859_v17, %v509_v21  ;;  %v890_v25 = vpop.f32.mrb[1].mxu0 }
 0x13c   : > { %v512_v26 = vpop.f32.mrb[2].mxu0 }
 0x13d   : > { %v584_v27 = vsel %vm582_vm3, %v577_v22, 0  ;;  %v576_v28 = vpack.c.bf16 %v510_v24, %v510_v24  ;;  %v891_v29 = vpop.f32.mrb[3].mxu0 }
 0x13e   : > { %901 = vmatpush3.bf16.msra.mxu0 %v584_v27 }
 0x141   : > { %903 = vmatmul.mubr.msk.bf16.vlgmr.msra.gmra.mrb[4].mxu0 %vm578_vm4, %v576_v28 }
 0x211   : > { %628 = sbr.rel (%p867_p1) target bundleno = 965 (0x3c5), region = 93 }
 0x214   : > { %v620_v30 = vpop.f32.mrb[4].mxu0 }
 0x215   : > { %v904_v31 = vpop.f32.mrb[5].mxu0  ;;  %630 = vmax.xlane.f32.xlu0 (!%p867_p1), %v620_v30 }
 0x216   : > { %v623_v32 = vpop.f32.mrb[6].mxu0 }
 0x217   : > { %v905_v33 = vpop.f32.mrb[7].mxu0 }
 0x2a2   : > { %v631_v36 = vpop.xlane.xlu0 %630 }
 0x2a3   : > { %v632_v37 = vmax.f32 %v629_v35, %v631_v36 }
 0x2a5   : > { %v634_v38 = vsub.f32 %v629_v35, %v632_v37  ;;  %651 = vst.msk [vmem:[#allocation2] sm:$0xff] %vm649_vm5, %v632_v37  ;;  %640 = vperm.xlu0 %1037, %v632_v37  }
 0x2a7   : > { %v635_v43 = vmul.f32 1.442695, %v634_v38 }
 0x324   : > { %v641_v39 = vpop.permute.xlu0 %640 }
 0x325   : > { %v643_v40 = vsub.f32 %v620_v30, %v641_v39 }
 0x327   : > { %v644_v41 = vmul.f32 1.442695, %v643_v40 }
 0x329   : > { %1038 = vpow2.f32 %v644_v41 }
 0x32a   : > { %1040 = vpow2.f32 %v635_v43 }
 0x333   : > { %v1039_v42 = vpop.eup %1038 }
 0x334   : > { %646 = vadd.xlane.f32.xlu1 %v1039_v42  ;;  %v1041_v44 = vpop.eup %1040 }
 0x335   : > { %v637_v46 = vmul.f32 %v1041_v44, %v633_v45 }
 0x3c1   : > { %v647_v47 = vpop.xlane.xlu1 %646 }
 0x3c2   : > { %v648_v48 = vadd.f32 %v647_v47, %v637_v46 }
 0x3c4   : > { %650 = vst.msk [vmem:[#allocation3] sm:$0xff] %vm649_vm5, %v648_v48 }
 0x3c5 PF: > { %p868_p2 = scmp.ne.s32.totalorder %s1165_s28, 1 }
 0x3c6   : > { %v658_v49 = vld [vmem:[#allocation2] sm:$0xff] (!%p868_p2)  ;;  %v1197_v51 = vmov (!%p868_p2), 0  }
 0x3c7   : > { %655 = sbr.rel (%p868_p2) target bundleno = 1114 (0x45a), region = 97  ;;  %1042 = vset.pattern.permute.xlu0 (!%p868_p2), %v1197_v51 }
 0x3c8   : > { %661 = vperm.xlu0 (!%p868_p2), %1042, %v658_v49  }
 0x3cb   : > { %v656_v50 = vld [vmem:[#allocation3] sm:$0xff] (!%p868_p2) }
 0x3cc   : > { %1043 = vrcp.f32 (!%p868_p2), %v656_v50 }
 0x3d6   : > { %v1044_v52 = vpop.eup %1043 }
 0x3d7   : > { %669 = vperm.xlu0 %1042, %v1044_v52  }
 0x447   : > { %v662_v53 = vpop.permute.xlu0 %661 }
 0x448   : > { %v664_v54 = vsub.f32 %v620_v30, %v662_v53 }
 0x44a   : > { %v665_v55 = vmul.f32 1.442695, %v664_v54 }
 0x44c   : > { %1045 = vpow2.f32 %v665_v55 }
 0x456   : > { %v1046_v56 = vpop.eup %1045  ;;  %v670_v57 = vpop.permute.xlu0 %669 }
 0x457   : > { %v672_v58 = vmul.f32 %v1046_v56, %v670_v57 }
 0x459   : > { %673 = vst [vmem:[%s405_s14] sm:$0xff] %v672_v58 }
 0x45a PF: > { %s870_s25 = sshll.u32 %s1157_s26, 1  ;;  %s871_s8 = sshll.u32 %s1169_s29, 4 }
 0x45b   : > { %s683_s7 = sadd.s32 %s1161_s27, %s870_s25  ;;  %s693_s15 = sshll.u32 %s405_s14, 4  ;;  %s1435_s15 = int_to_ptr.vmem [resolvable:$true] %s693_s15 }
 0x45c   : > { %s684_s9 = smul.u32 %s1165_s28, %s683_s7  ;;  %s1559_s6 = sld [smem:[#allocation26_spill]] }
 0x45d   : > { %s1560_s18 = sand.u32 1, %s1141_s22   ;;  %s1047_s19 = scalar_lea.vmem %s1435_s15, 128 }
 0x45e   : > { %s689_s16 = sadd.s32 %s871_s8, %s684_s9  ;;  %s675_s17 = scalar_lea.sflag [#allocation6], %s1560_s18 }
 0x45f   : > { %s872_s30 = sshll.u32 %s689_s16, 7  ;;  %p1048_p3 = scmp.ne.s32.totalorder %s1435_s15, %s1047_s19 }
 0x460   : > { %s1198_s26 = smov [#allocation5]  }
 0x461   : > { %p1049_p4 = pnand %p1048_p3, %p1341_p10  ;;  %s1051_s27 = sshll.u32 %s1198_s26, 4  ;;  %s1052_s27 = int_to_ptr.vmem [resolvable:$false] %s1051_s27 }
 0x462   : > { %s691_s12 = scalar_lea.hbm %s1559_s6, %s872_s30  ;;  %s1053_s28 = scalar_lea.vmem %s1052_s27, 256 }
 0x463   : > { %p1050_p5 = pneg %p1049_p4  ;;  %p1054_p6 = scmp.lt.s32.totalorder %s1435_s15, %s1052_s27 }
 0x464   : > { %p1055_p7 = scmp.lt.s32.totalorder %s1053_s28, %s1047_s19 }
 0x466   : > { %p1056_p8 = por %p1055_p7, %p1054_p6 }
 0x468   : > { %p1057_p9 = pnand %p1056_p8, %p1050_p5 }
 0x46a   : > { %1060 = shalt.err (!%p1057_p9)
}
 0x46b   : > { %s1061_s29 = scalar_lea.hbm %s691_s12, 128  ;;  %s1065_s5 = scalar_lea.hbm %s1559_s6, 4096 }
 0x46c   : > { %p1062_p11 = scmp.ne.s32.totalorder %s691_s12, %s1061_s29  ;;  %p1066_p1 = scmp.lt.u32.totalorder %s691_s12, %s1559_s6 }
 0x46d   : > { %p1067_p2 = scmp.lt.u32.totalorder %s1065_s5, %s1061_s29  ;;  %p1069_p4 = scmp.lt.u32.totalorder %s1061_s29, %s691_s12 }
 0x46e   : > { %p1063_p12 = pnand %p1062_p11, %p1341_p10 }
 0x46f   : > { %p1068_p3 = por %p1067_p2, %p1066_p1 }
 0x470   : > { %p1064_p13 = pneg %p1063_p12 }
 0x471   : > { %p1070_p6 = por %p1069_p4, %p1068_p3 }
 0x473   : > { %p1071_p5 = pnand %p1070_p6, %p1064_p13 }
 0x475   : > { %1074 = shalt.err (!%p1071_p5)
}
 0x476   : > { %906 = dma.vmem_to_hbm [thread:$0]  (%p1341_p10), %s1435_s15, 128, %s691_s12, %s675_s17  }
 0x477 PF: > { %s1561_s21 = sld [smem:[#allocation8_spill]]  ;;  %p912_p7 = scmp.ge.s32.totalorder %s1189_s10, 2 }
 0x479   : > { %p909_p8 = pnand %p912_p7, %p1350_p0 }
 0x47d   : > { %s705_s23 = sand.u32 1, %s1561_s21  }
 0x47e   : > { %s706_s25 = scalar_lea.sflag [#allocation6], %s705_s23 }
 0x47f   : > { %1132 = dma.done.wait (!%p909_p8), %s706_s25, 128  }
 0x480   : > { %1134 = vsyncadd (!%p909_p8), %s706_s25, 4294967168  ;;  %s19_s10 = sadd.s32 1, %s1189_s10   ;;  %s1564_s3 = sld [smem:[#allocation9_spill]] }
 0x481   : > { %p1463_p9 = scmp.ge.s32.totalorder %s19_s10, 66   ;;  %s1565_s23 = sld [smem:[#allocation21_spill]] }
 0x482   : > { %s1566_s24 = sld [smem:[#allocation10_spill]]  ;;  %s1567_s25 = sld [smem:[#allocation20_spill]] }
 0x483   : > { %s1568_s26 = sld [smem:[#allocation11_spill]]  ;;  %s1569_s27 = sld [smem:[#allocation12_spill]] }
 0x484   : > { %s1570_s28 = sld [smem:[#allocation13_spill]]  ;;  %s1571_s29 = sld [smem:[#allocation14_spill]] }
 0x485   : > { %s1572_s30 = sld [smem:[#allocation15_spill]]  ;;  %s1573_s8 = sld [smem:[#allocation16_spill]] }
 0x486   : > { %s1574_s9 = sld [smem:[#allocation17_spill]]  ;;  %s1575_s15 = sld [smem:[#allocation18_spill]] }
 0x487   : > { %s1577_s21 = smov %s1141_s22  ;;  %s1578_s22 = smov %s1564_s3 }
 0x488   :  { %18 = sbr.rel (!%p1463_p9) target bundleno = 14 (0xe), region = 152 }
 0x48b   : > { %s1579_s7 = smov %s1573_s8 }
 0x48c   : > { %s1580_s8 = smov %s1574_s9  ;;  %s1581_s9 = smov %s1575_s15 }
 0x48f   :  { %711 = vsyncpa [#allocation6], 1 }
 0x490   :  { %713 = vsyncpa [#allocation6 + $0x1], 1 }

</bundles_post_ra>
